<compile_context>
chip_gen: v7x
topology: tpu7x:2x2x1
jax: 0.10.0
libtpu: 0.0.40
codegen_flags: <defaults>
</compile_context>

<pallas_src>
import jax
import jax.numpy as jnp
from jax.experimental import pallas as pl
from jax.experimental.pallas import tpu as pltpu


def _round_up(x: int, m: int) -> int:
    return (x + m - 1) // m * m


def _fused_conv1d_relu_kernel(x_ref, w_ref, b_ref, o_ref):
    """One lane-dense output tile of relu(conv1d(x) + bias) for ALL filters at once.

    x_ref: (C_in, N_in_pad)        flattened (batch*length) input, bf16, resident in VMEM
    w_ref: (K_max, F*C_out, C_in)  one (F*C_out, C_in) MXU tile per conv tap, bf16
    b_ref: (F*C_out, 1)            f32
    o_ref: (F*C_out, TN)           TN is a multiple of 128
    """
    tn = o_ref.shape[-1]
    k_max = w_ref.shape[0]

    # 128-aligned dynamic window start; the +128 slack lanes cover all K_max-1 tap shifts.
    base = pl.multiple_of(pl.program_id(0) * tn, 128)
    x_win = x_ref[:, pl.ds(base, tn + 128)]                     # (C_in, TN + 128) bf16

    acc = jnp.zeros(o_ref.shape, jnp.float32)
    for k in range(k_max):                                      # K_max small & static -> unrolled
        x_k = x_win[:, k:k + tn]                                # static lane shift
        acc = acc + jnp.dot(w_ref[k], x_k,
                            preferred_element_type=jnp.float32)
    acc = acc + b_ref[...]                                      # (F*C_out, 1) broadcasts over lanes
    o_ref[...] = jnp.maximum(acc, 0.0).astype(o_ref.dtype)


def _pick_block_n(rows: int, c_in: int, n_out: int) -> int:
    """Adaptive output tile width: big when F*C_out is small, smaller when it is large."""
    budget_bytes = 160 * 1024                  # ~live f32 acc + bf16 tap window per lane column
    per_lane = 4 * rows + 2 * c_in
    tn = budget_bytes // max(per_lane, 1)
    tn = max(256, min(2048, tn))
    tn = (tn // 128) * 128
    return min(tn, n_out)


def _vmem_limit_bytes(c_in: int, n_in_pad: int, k_max: int, rows: int, tn: int) -> int:
    """Rough VMEM footprint (default pipelining double-buffers every block) + headroom."""
    x_bytes = _round_up(c_in, 8) * n_in_pad * 2                     # bf16 resident input
    w_bytes = k_max * _round_up(rows, 8) * _round_up(c_in, 128) * 2
    b_bytes = _round_up(rows, 8) * 128 * 4
    o_bytes = _round_up(rows, 8) * tn * 4
    need = 2 * (x_bytes + w_bytes + b_bytes + o_bytes) + (8 << 20)
    # Clamp: never below the 32 MiB scoped default, never above ~96 MiB (v5e/v6e have 128 MiB;
    # v7x has only 64 MiB/TC -- see TODO at top for the tiled-window fallback).
    return int(min(max(need, 32 << 20), 96 << 20))


def text_cnn1d_forward(x, weights, biases, *, block_n=None, compute_dtype=jnp.bfloat16):
    """Mirror TextCNN1D.forward: [relu(conv1d_fs(x)) for fs in filter_sizes], one fused kernel.

    x: (B, C_in, L); weights[f]: (C_out, C_in, K_f); biases[f]: (C_out,)
    Returns a list of (B, C_out, L - K_f + 1) arrays in x.dtype.
    """
    B, C_in, L = x.shape
    num_filters = len(weights)
    assert num_filters >= 1 and len(biases) == num_filters
    C_out = weights[0].shape[0]
    ksizes = [int(w.shape[-1]) for w in weights]
    for w, b in zip(weights, biases):
        assert w.shape[0] == C_out and w.shape[1] == C_in, "channel mismatch"
        assert b.shape == (C_out,)
    K_max = max(ksizes)
    assert 1 <= K_max <= 128, "kernel_size must be in [1, 128]"
    assert L - K_max + 1 >= 1, "sequence shorter than largest kernel_size"

    rows = num_filters * C_out

    # ---- lane-dense flattening of x: built ONCE and shared by every filter size ----
    L_pad = _round_up(L, 128)
    N_out = B * L_pad
    if block_n is None:
        block_n = _pick_block_n(rows, C_in, N_out)
    TN = min(_round_up(block_n, 128), N_out)
    grid_n = pl.cdiv(N_out, TN)
    N_out_pad = grid_n * TN
    N_in_pad = N_out_pad + 128                  # slack for the K_max-1 tap shifts

    x_t = jnp.transpose(x, (1, 0, 2))                           # (C_in, B, L)
    x_t = jnp.pad(x_t, ((0, 0), (0, 0), (0, L_pad - L)))
    x2d = x_t.reshape(C_in, N_out)
    x2d = jnp.pad(x2d, ((0, 0), (0, N_in_pad - N_out))).astype(compute_dtype)

    # ---- stack all filters: taps zero-padded to K_max, rows = F*C_out ----
    w_stk = jnp.concatenate(
        [jnp.pad(jnp.transpose(w, (2, 0, 1)), ((0, K_max - k), (0, 0), (0, 0)))
         for w, k in zip(weights, ksizes)],
        axis=1).astype(compute_dtype)                           # (K_max, F*C_out, C_in)
    b_stk = jnp.concatenate(list(biases)).reshape(rows, 1).astype(jnp.float32)

    cost = pl.CostEstimate(
        flops=2 * rows * C_in * K_max * N_out_pad,
        transcendentals=0,
        bytes_accessed=(2 * x2d.size + 2 * w_stk.size + 4 * b_stk.size
                        + 4 * rows * N_out_pad),
    )

    grid_spec = pltpu.PrefetchScalarGridSpec(
        num_scalar_prefetch=0,
        grid=(grid_n,),
        in_specs=[
            pl.BlockSpec((C_in, N_in_pad), lambda j: (0, 0)),    # constant block -> resident
            pl.BlockSpec((K_max, rows, C_in), lambda j: (0, 0, 0)),
            pl.BlockSpec((rows, 1), lambda j: (0, 0)),
        ],
        out_specs=pl.BlockSpec((rows, TN), lambda j: (0, j)),
    )

    out2d = pl.pallas_call(
        _fused_conv1d_relu_kernel,
        out_shape=jax.ShapeDtypeStruct((rows, N_out_pad), x.dtype),
        grid_spec=grid_spec,
        compiler_params=pltpu.CompilerParams(
            dimension_semantics=("parallel",),
            vmem_limit_bytes=_vmem_limit_bytes(C_in, N_in_pad, K_max, rows, TN),
        ),
        cost_estimate=cost,
    )(x2d, w_stk, b_stk)

    # Undo the lane-dense flattening and split per filter: rows f*C_out..(f+1)*C_out,
    # valid columns [:L - K_f + 1].
    out3d = out2d[:, :N_out].reshape(rows, B, L_pad)
    outs = []
    for f, k in enumerate(ksizes):
        rows_f = out3d[f * C_out:(f + 1) * C_out, :, :L - k + 1]   # (C_out, B, L_out_f)
        outs.append(jnp.transpose(rows_f, (1, 0, 2)))
    return outs


def init_text_cnn1d_params(key, in_channels, out_channels, filter_sizes):
    """xavier_uniform_ weights, constant 0.1 bias — mirrors TextCNN1D.init_params()."""
    keys = jax.random.split(key, len(filter_sizes))
    weights, biases = [], []
    for k, fs in zip(keys, filter_sizes):
        fan_in = in_channels * fs
        fan_out = out_channels * fs
        limit = (6.0 / (fan_in + fan_out)) ** 0.5
        weights.append(jax.random.uniform(
            k, (out_channels, in_channels, fs), jnp.float32, -limit, limit))
        biases.append(jnp.full((out_channels,), 0.1, jnp.float32))
    return weights, biases


def _reference_conv1d_relu(x, w, b):
    y = jax.lax.conv_general_dilated(
        x, w, window_strides=(1,), padding="VALID",
        dimension_numbers=("NCH", "OIH", "NCH"))
    return jax.nn.relu(y + b[None, :, None])


if __name__ == "__main__":
    key = jax.random.PRNGKey(0)
    kx, kp = jax.random.split(key)

    B, in_channels, L = 2, 4, 16
    out_channels = 8
    filter_sizes = (2, 3, 4)

    x = jax.random.normal(kx, (B, in_channels, L), dtype=jnp.float32)
    weights, biases = init_text_cnn1d_params(kp, in_channels, out_channels, filter_sizes)

    outs = text_cnn1d_forward(x, weights, biases)
    outs = jax.block_until_ready(outs)

    # Reference on bf16-rounded operands (kernel feeds the MXU bf16, accumulates in f32).
    x_bf = x.astype(jnp.bfloat16).astype(jnp.float32)
    for out, w, b, fs in zip(outs, weights, biases, filter_sizes):
        assert out.shape == (B, out_channels, L - fs + 1)
        w_bf = w.astype(jnp.bfloat16).astype(jnp.float32)
        ref = _reference_conv1d_relu(x_bf, w_bf, b)
        assert jnp.allclose(out, ref, atol=1e-3, rtol=1e-3), f"mismatch for filter_size={fs}"

    print("KERNEL_OK")
</pallas_src>

<mosaic_0001>
module attributes {stable_mosaic.version = 11 : i64} {
  func.func @_fused_conv1d_relu_kernel(%arg0: i32, %arg1: memref<4x384xbf16, #tpu.memory_space<vmem>>, %arg2: memref<4x24x4xbf16, #tpu.memory_space<vmem>>, %arg3: memref<24x1xf32, #tpu.memory_space<vmem>>, %arg4: memref<24x256xf32, #tpu.memory_space<vmem>>) attributes {dimension_semantics = [#tpu.dimension_semantics<parallel>], iteration_bounds = array<i64: 1>, scalar_prefetch = 0 : i64, scratch_operands = 0 : i64, tpu.core_type = #tpu.core_type<tc>, window_params = [{pipeline_mode = #tpu.pipeline_mode<synchronous>, transform_indices = @transform_0, window_bounds = array<i64: 4, 384>}, {pipeline_mode = #tpu.pipeline_mode<synchronous>, transform_indices = @transform_1, window_bounds = array<i64: 4, 24, 4>}, {pipeline_mode = #tpu.pipeline_mode<synchronous>, transform_indices = @transform_2, window_bounds = array<i64: 24, 1>}, {transform_indices = @transform_3, window_bounds = array<i64: 24, 256>}]} {
    %c256_i32 = arith.constant 256 : i32
    %0 = arith.muli %arg0, %c256_i32 : i32
    %1 = tpu.assume_multiple %0, 128 : i32
    %c0 = arith.constant 0 : index
    %2 = arith.index_cast %1 : i32 to index
    %3 = vector.load %arg1[%c0, %2] : memref<4x384xbf16, #tpu.memory_space<vmem>>, vector<4x384xbf16>
    %cst = arith.constant 0.000000e+00 : f32
    %4 = vector.broadcast %cst : f32 to vector<24x256xf32>
    %5 = vector.extract_strided_slice %3 {offsets = [0, 0], sizes = [4, 256], strides = [1, 1]} : vector<4x384xbf16> to vector<4x256xbf16>
    %c0_0 = arith.constant 0 : index
    %c0_1 = arith.constant 0 : index
    %c0_2 = arith.constant 0 : index
    %6 = vector.load %arg2[%c0_0, %c0_1, %c0_2] : memref<4x24x4xbf16, #tpu.memory_space<vmem>>, vector<1x24x4xbf16>
    %7 = vector.shape_cast %6 : vector<1x24x4xbf16> to vector<24x4xbf16>
    %cst_3 = arith.constant dense<0.000000e+00> : vector<24x256xf32>
    %8 = tpu.matmul %7, %5, %cst_3 {dimension_numbers = #tpu.dot_dimension_numbers<[1], [0], [0], [1], [0, 0, 1, 1], [], []>} : vector<24x4xbf16>, vector<4x256xbf16>, vector<24x256xf32> -> vector<24x256xf32>
    %9 = arith.addf %4, %8 : vector<24x256xf32>
    %10 = vector.extract_strided_slice %3 {offsets = [0, 1], sizes = [4, 256], strides = [1, 1]} : vector<4x384xbf16> to vector<4x256xbf16>
    %c1 = arith.constant 1 : index
    %c0_4 = arith.constant 0 : index
    %c0_5 = arith.constant 0 : index
    %11 = vector.load %arg2[%c1, %c0_4, %c0_5] : memref<4x24x4xbf16, #tpu.memory_space<vmem>>, vector<1x24x4xbf16>
    %12 = vector.shape_cast %11 : vector<1x24x4xbf16> to vector<24x4xbf16>
    %cst_6 = arith.constant dense<0.000000e+00> : vector<24x256xf32>
    %13 = tpu.matmul %12, %10, %cst_6 {dimension_numbers = #tpu.dot_dimension_numbers<[1], [0], [0], [1], [0, 0, 1, 1], [], []>} : vector<24x4xbf16>, vector<4x256xbf16>, vector<24x256xf32> -> vector<24x256xf32>
    %14 = arith.addf %9, %13 : vector<24x256xf32>
    %15 = vector.extract_strided_slice %3 {offsets = [0, 2], sizes = [4, 256], strides = [1, 1]} : vector<4x384xbf16> to vector<4x256xbf16>
    %c2 = arith.constant 2 : index
    %c0_7 = arith.constant 0 : index
    %c0_8 = arith.constant 0 : index
    %16 = vector.load %arg2[%c2, %c0_7, %c0_8] : memref<4x24x4xbf16, #tpu.memory_space<vmem>>, vector<1x24x4xbf16>
    %17 = vector.shape_cast %16 : vector<1x24x4xbf16> to vector<24x4xbf16>
    %cst_9 = arith.constant dense<0.000000e+00> : vector<24x256xf32>
    %18 = tpu.matmul %17, %15, %cst_9 {dimension_numbers = #tpu.dot_dimension_numbers<[1], [0], [0], [1], [0, 0, 1, 1], [], []>} : vector<24x4xbf16>, vector<4x256xbf16>, vector<24x256xf32> -> vector<24x256xf32>
    %19 = arith.addf %14, %18 : vector<24x256xf32>
    %20 = vector.extract_strided_slice %3 {offsets = [0, 3], sizes = [4, 256], strides = [1, 1]} : vector<4x384xbf16> to vector<4x256xbf16>
    %c3 = arith.constant 3 : index
    %c0_10 = arith.constant 0 : index
    %c0_11 = arith.constant 0 : index
    %21 = vector.load %arg2[%c3, %c0_10, %c0_11] : memref<4x24x4xbf16, #tpu.memory_space<vmem>>, vector<1x24x4xbf16>
    %22 = vector.shape_cast %21 : vector<1x24x4xbf16> to vector<24x4xbf16>
    %cst_12 = arith.constant dense<0.000000e+00> : vector<24x256xf32>
    %23 = tpu.matmul %22, %20, %cst_12 {dimension_numbers = #tpu.dot_dimension_numbers<[1], [0], [0], [1], [0, 0, 1, 1], [], []>} : vector<24x4xbf16>, vector<4x256xbf16>, vector<24x256xf32> -> vector<24x256xf32>
    %24 = arith.addf %19, %23 : vector<24x256xf32>
    %c0_13 = arith.constant 0 : index
    %c0_14 = arith.constant 0 : index
    %25 = vector.load %arg3[%c0_13, %c0_14] : memref<24x1xf32, #tpu.memory_space<vmem>>, vector<24x1xf32>
    %26 = vector.broadcast %25 : vector<24x1xf32> to vector<24x256xf32>
    %27 = arith.addf %24, %26 : vector<24x256xf32>
    %cst_15 = arith.constant 0.000000e+00 : f32
    %28 = vector.broadcast %cst_15 : f32 to vector<24x256xf32>
    %29 = arith.maximumf %27, %28 : vector<24x256xf32>
    %c0_16 = arith.constant 0 : index
    %c0_17 = arith.constant 0 : index
    %30 = vector.load %arg4[%c0_16, %c0_17] : memref<24x256xf32, #tpu.memory_space<vmem>>, vector<24x256xf32>
    tpu.vector_store %arg4[%c0_16, %c0_17], %29 {strides = array<i32>} : memref<24x256xf32, #tpu.memory_space<vmem>>, vector<24x256xf32>,
    return
  }
  func.func @transform_0(%arg0: i32) -> (i32, i32) {
    %c0_i32 = arith.constant 0 : i32
    %c0_i32_0 = arith.constant 0 : i32
    %c0_i32_1 = arith.constant 0 : i32
    return %c0_i32, %c0_i32_0 : i32, i32
  }
  func.func @transform_1(%arg0: i32) -> (i32, i32, i32) {
    %c0_i32 = arith.constant 0 : i32
    %c0_i32_0 = arith.constant 0 : i32
    %c0_i32_1 = arith.constant 0 : i32
    %c0_i32_2 = arith.constant 0 : i32
    return %c0_i32, %c0_i32_0, %c0_i32_1 : i32, i32, i32
  }
  func.func @transform_2(%arg0: i32) -> (i32, i32) {
    %c0_i32 = arith.constant 0 : i32
    %c0_i32_0 = arith.constant 0 : i32
    %c0_i32_1 = arith.constant 0 : i32
    return %c0_i32, %c0_i32_0 : i32, i32
  }
  func.func @transform_3(%arg0: i32) -> (i32, i32) {
    %c0_i32 = arith.constant 0 : i32
    %c0_i32_0 = arith.constant 0 : i32
    return %c0_i32, %arg0 : i32, i32
  }
}

</mosaic_0001>

<bundles_post_ra>
// kernel: tpu_custom_call.1
= control target key start
LH: loop header
LB: loop body
LE: loop exit
PB: predicated region body
PF: predicated region fallthrough
CT: control target
= control target key end

     0   :  { %v42_v1 = vlaneseq  ;;  %v517_v2 = vmov 1983009808   ;;  %v518_v7 = vmov 0   ;;  %s619_s0 = inlined_call_operand.vmem [shape: bf16[4,384], index: 0, kind: input, shape index: {}]   ;;  %s620_s1 = inlined_call_operand.vmem [shape: bf16[4,24,4], index: 1, kind: input, shape index: {}]   ;;  %s621_s2 = inlined_call_operand.vmem [shape: f32[24,1], index: 2, kind: input, shape index: {}]   ;;  %s622_s3 = inlined_call_operand.hbm [shape: f32[24,256], index: 3, kind: output, shape index: {}]  }
   0x1   :  { %v21_v0 = vld [vmem:[%s619_s0] sm:$0x3f]  ;;  %v40_v3 = vunpack.c.l.s4 %v517_v2  ;;  %109 = vmatprep.mubr.bf16.mxu1 %v518_v7  ;;  %264 = vmatprep.mubr.bf16.mxu0 %v518_v7 }
   0x2   :  { %v43_v4 = vshrl.u32 %v42_v1, 7  ;;  %v38_v6 = vcombine.high %v21_v0, %v21_v0  ;;  %482 = vset.pattern.permute.xlu1 %v518_v7  ;;  %483 = vset.pattern.permute.xlu0 %v518_v7 }
   0x3   :  { %v41_v5 = vunpack.c.0.s8 %v40_v3 }
   0x5   :  { %v44_v8 = vsub.s32 %v41_v5, %v43_v4 }
   0x6   :  { %8 = vsyncpa [#allocation3], 0  ;;  %s519_s0 = smov 127   ;;  %s520_s14 = smov 126   ;;  %v379_v12 = vld [vmem:[%s621_s2] sm:$0xff]  ;;  %v380_v13 = vld [vmem:[%s621_s2 + $0x8] sm:$0xff] }
   0x7   :  { %v45_v9 = vrot.slane %v21_v0, %v44_v8  ;;  %v52_v10 = vrot.slane %v38_v6, %v44_v8  ;;  %s521_s15 = smov 125   ;;  %v381_v14 = vld [vmem:[%s621_s2 + $0x10] sm:$0xff]  ;;  %vm60_vm0 = vcmask 1039360   ;;  %vm70_vm1 = vcmask 1041408   ;;  %v486_v29 = vld [vmem:[%s620_s1 + $0x18] sm:$0xff]   ;;  %v489_v38 = vld [vmem:[%s620_s1] sm:$0xff]  }
   0x8   :  { %v485_v22 = vld [vmem:[%s620_s1 + $0xc] sm:$0xff]   ;;  %vm217_vm2 = vcmask 1031168   ;;  %vm63_vm3 = vcmask 31744   ;;  %vm307_vm4 = vcmask 1022976   ;;  %v487_v33 = vld [vmem:[%s620_s1 + $0x14] ss:$0 sps:$4 sm:$0xff]  }
   0x9   :  { %54 = vrot.lane.b32.xlu0 %v45_v9, %s519_s0  ;;  %58 = vrot.lane.b32.xlu1 %v52_v10, %s519_s0  ;;  %v53_v11 = vcombine.high %v45_v9, %v45_v9  ;;  %v143_v25 = vsel %vm70_vm1, %v45_v9, 0  ;;  %v488_v37 = vld [vmem:[%s620_s1 + $0x20] ss:$0 sps:$4 sm:$0xff]   ;;  %v490_v39 = vld [vmem:[%s620_s1 + $0x24] sm:$0xff]  }
   0xa   :  { %v491_v40 = vld [vmem:[%s620_s1 + $0x8] ss:$0 sps:$4 sm:$0xff]   ;;  %v492_v41 = vld [vmem:[%s620_s1 + $0x2c] ss:$0 sps:$4 sm:$0xff]   ;;  %s522_s1 = smov [#allocation2]  }
   0xb   :  { %s420_s10 = sshll.u32 %s522_s1, 4  ;;  %s421_s10 = int_to_ptr.vmem [resolvable:$true] %s420_s10 }
   0xc   :  { %s493_s11 = scalar_lea.vmem %s421_s10, 768  ;;  %p498_p1 = scmp.lt.s32.totalorder %s421_s10, %s421_s10 }
   0xd   :  { %56 = vrot.lane.b32.xlu0 %v53_v11, %s519_s0  ;;  %211 = vrot.lane.b32.xlu1 %v45_v9, %s520_s14  ;;  %p494_p0 = scmp.ne.s32.totalorder %s421_s10, %s493_s11  ;;  %p499_p2 = scmp.lt.s32.totalorder %s493_s11, %s493_s11 }
   0xf   :  { %p500_p3 = por %p499_p2, %p498_p1 }
  0x11   :  { %213 = vrot.lane.b32.xlu0 %v53_v11, %s520_s14  ;;  %215 = vrot.lane.b32.xlu1 %v52_v10, %s520_s14  ;;  %p501_p4 = pnand %p500_p3, %p494_p0 }
  0x15   :  { %301 = vrot.lane.b32.xlu0 %v45_v9, %s521_s15  ;;  %303 = vrot.lane.b32.xlu1 %v53_v11, %s521_s15 }
  0x19   :  { %305 = vrot.lane.b32.xlu0 %v52_v10, %s521_s15  ;;  %384 = vperm.xlu1 %482, %v379_v12  }
  0x1d   :  { %389 = vperm.xlu0 %483, %v380_v13   ;;  %394 = vperm.xlu1 %482, %v381_v14  }
  0x7b   :  { %v55_v15 = vpop.permute.xlu0 %54  ;;  %v59_v16 = vpop.permute.xlu1 %58 }
  0x7f   :  { %v57_v17 = vpop.permute.xlu0 %56  ;;  %v212_v18 = vpop.permute.xlu1 %211 }
  0x80   :  { %v62_v19 = vsel %vm60_vm0, %v57_v17, %v59_v16  ;;  %v61_v20 = vsel %vm60_vm0, %v55_v15, %v57_v17 }
  0x81   :  { %438 = vmatprep.subr.msk.bf16.mxu1 %vm70_vm1, %v62_v19  ;;  %v72_v21 = vsel %vm70_vm1, %v61_v20, 0 }
  0x82   :  { %78 = vmatpush1.bf16.msra.mxu1 %v72_v21 }
  0x83   :  { %v214_v23 = vpop.permute.xlu0 %213  ;;  %v216_v24 = vpop.permute.xlu1 %215  ;;  %443 = vmatprep.subr.msk.bf16.mxu1 %vm70_vm1, %v53_v11 }
  0x84   :  { %v219_v26 = vsel %vm217_vm2, %v214_v23, %v216_v24  ;;  %v218_v27 = vsel %vm217_vm2, %v212_v18, %v214_v23 }
  0x85   :  { %439 = vmatmul.mubr.msk.bf16.vlgmr.msra.gmra.mrb[0].mxu1 %vm63_vm3, %v485_v22  ;;  %451 = vmatprep.subr.msk.bf16.mxu0 %vm70_vm1, %v219_v26  ;;  %v227_v28 = vsel %vm70_vm1, %v218_v27, 0 }
  0x86   :  { %233 = vmatpush1.bf16.msra.mxu0 %v227_v28  ;;  %149 = vmatpush1.bf16.msra.mxu1 %v143_v25 }
  0x87   :  { %v302_v30 = vpop.permute.xlu0 %301  ;;  %v304_v31 = vpop.permute.xlu1 %303  ;;  %119 = vmatprep.mubr.bf16.mxu1 %v518_v7 }
  0x88   :  { %v308_v32 = vsel %vm307_vm4, %v302_v30, %v304_v31 }
  0x89   :  { %452 = vmatmul.mubr.msk.bf16.vlgmr.msra.gmra.mrb[0].mxu0 %vm63_vm3, %v486_v29  ;;  %v317_v34 = vsel %vm70_vm1, %v308_v32, 0 }
  0x8a   :  { %274 = vmatprep.mubr.bf16.mxu0 %v518_v7 }
  0x8b   :  { %v306_v35 = vpop.permute.xlu0 %305 }
  0x8c   :  { %v309_v36 = vsel %vm307_vm4, %v304_v31, %v306_v35 }
  0x8d   :  { %440 = vmatmul.mubr.msk.bf16.gmra.mrb[4].mxu1 %vm63_vm3, %v487_v33  ;;  %459 = vmatprep.subr.msk.bf16.mxu0 %vm70_vm1, %v309_v36 }
  0x8e   :  { %323 = vmatpush1.bf16.msra.mxu0 %v317_v34  ;;  %180 = vmatprep.mubr.bf16.mxu1 %v518_v7 }
  0x91   :  { %453 = vmatmul.mubr.msk.bf16.gmra.mrb[4].mxu0 %vm63_vm3, %v488_v37 }
  0x92   :  { %354 = vmatprep.mubr.bf16.mxu0 %v518_v7 }
  0x95   :  { %444 = vmatmul.mubr.msk.bf16.vlgmr.msra.gmra.mrb[0].mxu1 %vm63_vm3, %v489_v38 }
  0x96   :  { %190 = vmatprep.mubr.bf16.mxu1 %v518_v7 }
  0x98   :  { %v385_v55 = vpop.permute.xlu1 %384 }
  0x99   :  { %460 = vmatmul.mubr.msk.bf16.vlgmr.msra.gmra.mrb[0].mxu0 %vm63_vm3, %v490_v39 }
  0x9a   :  { %364 = vmatprep.mubr.bf16.mxu0 %v518_v7 }
  0x9c   :  { %v390_v60 = vpop.permute.xlu0 %389  ;;  %v395_v20 = vpop.permute.xlu1 %394 }
  0x9d   :  { %445 = vmatmul.mubr.msk.bf16.gmra.mrb[8].mxu1 %vm63_vm3, %v491_v40 }
  0xa1   :  { %461 = vmatmul.mubr.msk.bf16.gmra.mrb[8].mxu0 %vm63_vm3, %v492_v41 }
 0x160   :  { %v121_v42 = vpop.f32.mrb[4].mxu1 }
 0x161   :  { %v123_v43 = vpop.f32.mrb[5].mxu1 }
 0x162   :  { %v125_v44 = vpop.f32.mrb[6].mxu1 }
 0x163   :  { %v126_v45 = vpop.f32.mrb[7].mxu1 }
 0x164   :  { %v276_v46 = vpop.f32.mrb[4].mxu0 }
 0x165   :  { %v278_v47 = vpop.f32.mrb[5].mxu0 }
 0x166   :  { %v280_v48 = vpop.f32.mrb[6].mxu0 }
 0x167   :  { %v281_v49 = vpop.f32.mrb[7].mxu0 }
 0x168   :  { %v182_v50 = vpop.f32.mrb[0].mxu1 }
 0x169   :  { %v184_v51 = vpop.f32.mrb[1].mxu1 }
 0x16a   :  { %v186_v52 = vpop.f32.mrb[2].mxu1 }
 0x16b   :  { %v188_v53 = vpop.f32.mrb[3].mxu1 }
 0x16c   :  { %v356_v54 = vpop.f32.mrb[0].mxu0 }
 0x16d   :  { %v462_v56 = vadd.f32 %v356_v54, %v182_v50  ;;  %v358_v57 = vpop.f32.mrb[1].mxu0 }
 0x16e   :  { %v463_v58 = vadd.f32 %v358_v57, %v184_v51  ;;  %v360_v59 = vpop.f32.mrb[2].mxu0 }
 0x16f   :  { %v464_v61 = vadd.f32 %v360_v59, %v186_v52  ;;  %v397_v62 = vadd.f32 %v462_v56, %v385_v55  ;;  %v362_v63 = vpop.f32.mrb[3].mxu0 }
 0x170   :  { %v398_v0 = vadd.f32 %v463_v58, %v385_v55  ;;  %v465_v1 = vadd.f32 %v362_v63, %v188_v53  ;;  %v192_v2 = vpop.f32.mrb[8].mxu1 }
 0x171   :  { %v403_v3 = vmax.f32 %v397_v62, 0.0  ;;  %v399_v4 = vadd.f32 %v464_v61, %v390_v60  ;;  %v193_v5 = vadd.f32 %v192_v2, %v121_v42  ;;  %v194_v6 = vpop.f32.mrb[9].mxu1 }
 0x172   :  { %v404_v7 = vmax.f32 %v398_v0, 0.0  ;;  %v400_v8 = vadd.f32 %v465_v1, %v390_v60  ;;  %v195_v9 = vadd.f32 %v194_v6, %v123_v43  ;;  %v196_v10 = vpop.f32.mrb[10].mxu1 }
 0x173   :  { %409 = vst [vmem:[#allocation2] sm:$0xff] %v403_v3  ;;  %v405_v11 = vmax.f32 %v399_v4, 0.0  ;;  %v287_v12 = vadd.f32 %v276_v46, %v193_v5  ;;  %v197_v13 = vpop.f32.mrb[11].mxu1 }
 0x174   :  { %410 = vst [vmem:[#allocation2 + $0x8] sm:$0xff] %v404_v7  ;;  %v406_v14 = vmax.f32 %v400_v8, 0.0  ;;  %v366_v15 = vpop.f32.mrb[8].mxu0  ;;  %v288_v16 = vadd.f32 %v278_v47, %v195_v9 }
 0x175   :  { %411 = vst [vmem:[#allocation2 + $0x10] sm:$0xff] %v405_v11  ;;  %v377_v17 = vadd.f32 %v366_v15, %v287_v12  ;;  %v368_v18 = vpop.f32.mrb[9].mxu0 }
 0x176   :  { %412 = vst [vmem:[#allocation2 + $0x18] sm:$0xff] %v406_v14  ;;  %v378_v19 = vadd.f32 %v368_v18, %v288_v16  ;;  %v370_v21 = vpop.f32.mrb[10].mxu0 }
 0x177   :  { %v401_v22 = vadd.f32 %v395_v20, %v377_v17  ;;  %v371_v23 = vpop.f32.mrb[11].mxu0 }
 0x178   :  { %v402_v24 = vadd.f32 %v395_v20, %v378_v19 }
 0x179   :  { %v407_v25 = vmax.f32 %v401_v22, 0.0 }
 0x17a   :  { %v408_v26 = vmax.f32 %v402_v24, 0.0 }
 0x17b   :  { %413 = vst [vmem:[#allocation2 + $0x20] sm:$0xff] %v407_v25 }
 0x17c   :  { %414 = vst [vmem:[#allocation2 + $0x28] sm:$0xff] %v408_v26 }
 0x17d   :  { %504 = shalt.err (!%p501_p4)
}
 0x17e   :  { %s505_s0 = scalar_lea.hbm %s622_s3, 768 }
 0x17f   :  { %p506_p5 = scmp.ne.s32.totalorder %s622_s3, %s505_s0  ;;  %p509_p6 = scmp.lt.u32.totalorder %s505_s0, %s622_s3 }
 0x181   :  { %p511_p7 = pnand %p509_p6, %p506_p5 }
 0x183   :  { %514 = shalt.err (!%p511_p7)
}
 0x184   :  { %s523_s18 = smov 256   ;;  %s524_s19 = smov 16  }
 0x185   :  { %426 = dma.vmem_to_hbm [thread:$0]  %s421_s10, 768, %s622_s3, [#allocation3], %s523_s18, %s523_s18, %s524_s19  }
 0x186   :  { %515 = dma.done.wait [#allocation3], 768  }
 0x187   :  { %516 = vsyncadd [#allocation3], 4294966528 }
 0x188   :  { %430 = vsyncpa [#allocation3], 1 }

</bundles_post_ra>
